<compile_context>
chip_gen: v7x
topology: tpu7x:2x2x1
jax: 0.10.0
libtpu: 0.0.40
codegen_flags: <defaults>
</compile_context>

<pallas_src>
import numpy as np
import jax
import jax.numpy as jnp
from jax import lax
from jax.experimental import pallas as pl
from jax.experimental.pallas import tpu as pltpu


def _softplus(y):
    # numerically stable softplus;  -logsigmoid(x) == softplus(-x)
    return jnp.maximum(y, 0.0) + jnp.log1p(jnp.exp(-jnp.abs(y)))


def triplet_loss_kernel(zp_ref, zn_ref, zall_ref, w_ref, out_ref):
    zp = zp_ref[...]              # [TB, D]   anchor tile of z_pos
    zn = zn_ref[...]              # [TB, D]   anchor tile of z_neg
    zall = zall_ref[...]          # [bs, D]   full z_neg (Gram RHS)
    w = w_ref[...]                # [TB, bs]  f32 count/K selection weights

    # Gram scores on the MXU: G[i, j] = <z_neg_tile[i], z_neg[j]>
    g = lax.dot_general(zn, zall, (((1,), (1,)), ((), ())),
                        preferred_element_type=jnp.float32)         # [TB, bs]

    # positive scores <z_neg[i], z_pos[i]>: elementwise product reduced on the
    # MXU via a ones[D, 1] column (keeps the reduction off the XLU).
    ones_d = jnp.ones((zp.shape[1], 1), dtype=zp.dtype)
    pos = lax.dot_general(zn * zp, ones_d, (((1,), (0,)), ((), ())),
                          preferred_element_type=jnp.float32)       # [TB, 1]

    loss_pos = _softplus(-pos)                                      # [TB, 1]

    # negative loss: sum_j W[i,j] * softplus(G[i,j]); W already folds 1/K and
    # duplicate sampled indices, and the j-reduction also rides the MXU.
    ones_b = jnp.ones((w.shape[1], 1), dtype=jnp.float32)
    loss_neg = lax.dot_general(w * _softplus(g), ones_b,
                               (((1,), (0,)), ((), ())),
                               preferred_element_type=jnp.float32)  # [TB, 1]

    out_ref[...] = loss_pos + loss_neg                              # [TB, 1]


def _pick_batch_tile(bs, z_size, vmem_budget_bytes=24 << 20):
    """Largest batch tile that divides bs, is 8-aligned (or == bs), and keeps
    the double-buffered VMEM footprint within budget (sized for v7x 64 MiB;
    v5e/v6e have 2x the headroom)."""
    def footprint(tb):
        # double-buffered: z_pos tile + z_neg tile + full z_neg + W tile + out
        return 2 * 4 * (2 * tb * z_size + bs * z_size + tb * bs + tb)
    if footprint(bs) <= vmem_budget_bytes:
        return bs
    cands = [tb for tb in range(8, bs, 8)
             if bs % tb == 0 and footprint(tb) <= vmem_budget_bytes]
    return max(cands) if cands else bs


def triplet_loss_pallas(z_pos, z_neg, neg_idx):
    """
    z_pos:   [bs, z_size]
    z_neg:   [bs, z_size]
    neg_idx: [bs, K] int32 indices into z_neg (sampled negatives per anchor)
    returns: scalar f32 loss
    """
    bs, z_size = z_pos.shape
    K = neg_idx.shape[1]

    # Fold the negative sampling into a [bs, bs] weight matrix:
    #   W[i, j] = (#times j appears in neg_idx[i]) / K
    # so loss_neg[i] = sum_j W[i,j] * softplus(G[i,j]).  Only bs*bs scalars are
    # shipped instead of a [bs, K, D] gathered tensor.
    rows = jnp.arange(bs, dtype=jnp.int32)[:, None]
    w = jnp.zeros((bs, bs), jnp.float32).at[rows, neg_idx].add(1.0) / K

    tb = _pick_batch_tile(bs, z_size)
    num_tiles = bs // tb

    per_row = pl.pallas_call(
        triplet_loss_kernel,
        out_shape=jax.ShapeDtypeStruct((bs, 1), jnp.float32),
        grid=(num_tiles,),
        in_specs=[
            pl.BlockSpec((tb, z_size), lambda i: (i, 0)),   # z_pos anchor tile
            pl.BlockSpec((tb, z_size), lambda i: (i, 0)),   # z_neg anchor tile
            pl.BlockSpec((bs, z_size), lambda i: (0, 0)),   # full z_neg (Gram RHS)
            pl.BlockSpec((tb, bs), lambda i: (i, 0)),       # W tile
        ],
        out_specs=pl.BlockSpec((tb, 1), lambda i: (i, 0)),
        compiler_params=pltpu.CompilerParams(
            dimension_semantics=("parallel",),
            vmem_limit_bytes=48 * 1024 * 1024),
    )(z_pos, z_neg, z_neg, w)

    return jnp.mean(per_row)


def sample_neg_indices(bs, K, seed=0):
    # Deterministic replication of the module's negative sampling:
    # for each anchor i, pick K indices of *other* rows of z_neg.
    # (The exact np.random draw of the original cannot be bit-reproduced;
    #  we use a fixed-seed RandomState and exclude the anchor itself.)
    rng = np.random.RandomState(seed)
    idx = np.empty((bs, K), dtype=np.int32)
    for i in range(bs):
        cand = np.concatenate([np.arange(0, i), np.arange(i + 1, bs)])
        idx[i] = rng.choice(cand, K)
    return jnp.asarray(idx, dtype=jnp.int32)


def triplet_loss_ref(z_pos, z_neg, neg_idx):
    # pure-JAX reference (explicit f32 elementwise sums) for sanity check
    pos_dot = jnp.sum(z_neg * z_pos, axis=-1)
    zg = z_neg[neg_idx]                                        # [bs, K, D]
    neg_dot = jnp.sum(z_neg[:, None, :] * zg, axis=-1)         # [bs, K]
    loss_pos = -jax.nn.log_sigmoid(pos_dot)
    loss_neg = -jnp.mean(jax.nn.log_sigmoid(-neg_dot), axis=-1)
    return jnp.mean(loss_pos + loss_neg)


if __name__ == "__main__":
    bs, z_size, K = 8, 32, 4        # assert bs - 1 >= K
    key = jax.random.PRNGKey(0)
    k1, k2 = jax.random.split(key)
    z_pos = jax.random.normal(k1, (bs, z_size), dtype=jnp.float32)
    z_neg = jax.random.normal(k2, (bs, z_size), dtype=jnp.float32)
    neg_idx = sample_neg_indices(bs, K, seed=0)

    loss = jax.block_until_ready(triplet_loss_pallas(z_pos, z_neg, neg_idx))

    ref = triplet_loss_ref(z_pos, z_neg, neg_idx)
    assert np.allclose(np.asarray(loss), np.asarray(ref), rtol=1e-4, atol=1e-4), (loss, ref)

    print("KERNEL_OK")
</pallas_src>

<mosaic_0001>
module attributes {stable_mosaic.version = 11 : i64} {
  func.func @triplet_loss_kernel(%arg0: i32, %arg1: memref<8x32xf32, #tpu.memory_space<vmem>>, %arg2: memref<8x32xf32, #tpu.memory_space<vmem>>, %arg3: memref<8x32xf32, #tpu.memory_space<vmem>>, %arg4: memref<8x8xf32, #tpu.memory_space<vmem>>, %arg5: memref<8x1xf32, #tpu.memory_space<vmem>>) attributes {dimension_semantics = [#tpu.dimension_semantics<parallel>], iteration_bounds = array<i64: 1>, scalar_prefetch = 0 : i64, scratch_operands = 0 : i64, tpu.core_type = #tpu.core_type<tc>, window_params = [{transform_indices = @transform_0, window_bounds = array<i64: 8, 32>}, {transform_indices = @transform_1, window_bounds = array<i64: 8, 32>}, {pipeline_mode = #tpu.pipeline_mode<synchronous>, transform_indices = @transform_2, window_bounds = array<i64: 8, 32>}, {transform_indices = @transform_3, window_bounds = array<i64: 8, 8>}, {transform_indices = @transform_4, window_bounds = array<i64: 8, 1>}]} {
    %c0 = arith.constant 0 : index
    %c0_0 = arith.constant 0 : index
    %0 = vector.load %arg1[%c0, %c0_0] : memref<8x32xf32, #tpu.memory_space<vmem>>, vector<8x32xf32>
    %c0_1 = arith.constant 0 : index
    %c0_2 = arith.constant 0 : index
    %1 = vector.load %arg2[%c0_1, %c0_2] : memref<8x32xf32, #tpu.memory_space<vmem>>, vector<8x32xf32>
    %c0_3 = arith.constant 0 : index
    %c0_4 = arith.constant 0 : index
    %2 = vector.load %arg3[%c0_3, %c0_4] : memref<8x32xf32, #tpu.memory_space<vmem>>, vector<8x32xf32>
    %c0_5 = arith.constant 0 : index
    %c0_6 = arith.constant 0 : index
    %3 = vector.load %arg4[%c0_5, %c0_6] : memref<8x8xf32, #tpu.memory_space<vmem>>, vector<8x8xf32>
    %cst = arith.constant dense<0.000000e+00> : vector<8x8xf32>
    %4 = tpu.matmul %1, %2, %cst {dimension_numbers = #tpu.dot_dimension_numbers<[1], [1], [0], [0], [0, 0, 1, 0], [], []>} : vector<8x32xf32>, vector<8x32xf32>, vector<8x8xf32> -> vector<8x8xf32>
    %cst_7 = arith.constant 1.000000e+00 : f32
    %5 = vector.broadcast %cst_7 : f32 to vector<32x1xf32>
    %6 = arith.mulf %1, %0 : vector<8x32xf32>
    %cst_8 = arith.constant dense<0.000000e+00> : vector<8x1xf32>
    %7 = tpu.matmul %6, %5, %cst_8 {dimension_numbers = #tpu.dot_dimension_numbers<[1], [0], [0], [1], [0, 0, 1, 1], [], []>} : vector<8x32xf32>, vector<32x1xf32>, vector<8x1xf32> -> vector<8x1xf32>
    %cst_9 = arith.constant 0.000000e+00 : f32
    %8 = vector.broadcast %cst_9 : f32 to vector<8x1xf32>
    %9 = arith.subf %8, %7 : vector<8x1xf32>
    %cst_10 = arith.constant 0.000000e+00 : f32
    %10 = vector.broadcast %cst_10 : f32 to vector<8x1xf32>
    %11 = arith.maximumf %9, %10 : vector<8x1xf32>
    %12 = math.absf %9 : vector<8x1xf32>
    %cst_11 = arith.constant 0.000000e+00 : f32
    %13 = vector.broadcast %cst_11 : f32 to vector<8x1xf32>
    %14 = arith.subf %13, %12 : vector<8x1xf32>
    %15 = math.exp %14 : vector<8x1xf32>
    %16 = math.log1p %15 : vector<8x1xf32>
    %17 = arith.addf %11, %16 : vector<8x1xf32>
    %cst_12 = arith.constant 1.000000e+00 : f32
    %18 = vector.broadcast %cst_12 : f32 to vector<8x1xf32>
    %cst_13 = arith.constant 0.000000e+00 : f32
    %19 = vector.broadcast %cst_13 : f32 to vector<8x8xf32>
    %20 = arith.maximumf %4, %19 : vector<8x8xf32>
    %21 = math.absf %4 : vector<8x8xf32>
    %cst_14 = arith.constant 0.000000e+00 : f32
    %22 = vector.broadcast %cst_14 : f32 to vector<8x8xf32>
    %23 = arith.subf %22, %21 : vector<8x8xf32>
    %24 = math.exp %23 : vector<8x8xf32>
    %25 = math.log1p %24 : vector<8x8xf32>
    %26 = arith.addf %20, %25 : vector<8x8xf32>
    %27 = arith.mulf %3, %26 : vector<8x8xf32>
    %cst_15 = arith.constant dense<0.000000e+00> : vector<8x1xf32>
    %28 = tpu.matmul %27, %18, %cst_15 {dimension_numbers = #tpu.dot_dimension_numbers<[1], [0], [0], [1], [0, 0, 1, 1], [], []>} : vector<8x8xf32>, vector<8x1xf32>, vector<8x1xf32> -> vector<8x1xf32>
    %29 = arith.addf %17, %28 : vector<8x1xf32>
    %c0_16 = arith.constant 0 : index
    %c0_17 = arith.constant 0 : index
    %30 = vector.load %arg5[%c0_16, %c0_17] : memref<8x1xf32, #tpu.memory_space<vmem>>, vector<8x1xf32>
    tpu.vector_store %arg5[%c0_16, %c0_17], %29 {strides = array<i32>} : memref<8x1xf32, #tpu.memory_space<vmem>>, vector<8x1xf32>,
    return
  }
  func.func @transform_0(%arg0: i32) -> (i32, i32) {
    %c0_i32 = arith.constant 0 : i32
    %c0_i32_0 = arith.constant 0 : i32
    return %arg0, %c0_i32 : i32, i32
  }
  func.func @transform_1(%arg0: i32) -> (i32, i32) {
    %c0_i32 = arith.constant 0 : i32
    %c0_i32_0 = arith.constant 0 : i32
    return %arg0, %c0_i32 : i32, i32
  }
  func.func @transform_2(%arg0: i32) -> (i32, i32) {
    %c0_i32 = arith.constant 0 : i32
    %c0_i32_0 = arith.constant 0 : i32
    %c0_i32_1 = arith.constant 0 : i32
    return %c0_i32, %c0_i32_0 : i32, i32
  }
  func.func @transform_3(%arg0: i32) -> (i32, i32) {
    %c0_i32 = arith.constant 0 : i32
    %c0_i32_0 = arith.constant 0 : i32
    return %arg0, %c0_i32 : i32, i32
  }
  func.func @transform_4(%arg0: i32) -> (i32, i32) {
    %c0_i32 = arith.constant 0 : i32
    %c0_i32_0 = arith.constant 0 : i32
    return %arg0, %c0_i32 : i32, i32
  }
}

</mosaic_0001>

<bundles_post_ra>
// kernel: tpu_custom_call.1
= control target key start
LH: loop header
LB: loop body
LE: loop exit
PB: predicated region body
PF: predicated region fallthrough
CT: control target
= control target key end

     0   :  { %9 = vsyncpa [#allocation3], 0  ;;  %s524_s0 = inlined_call_operand.hbm [shape: f32[8,32], index: 0, kind: input, shape index: {}]   ;;  %s525_s1 = inlined_call_operand.hbm [shape: f32[8,32], index: 1, kind: input, shape index: {}]   ;;  %s526_s2 = inlined_call_operand.hbm [shape: f32[8,32], index: 2, kind: input, shape index: {}]   ;;  %s527_s3 = inlined_call_operand.vmem [shape: f32[8,8], index: 3, kind: input, shape index: {}]   ;;  %s528_s4 = inlined_call_operand.vmem [shape: f32[8,1], index: 4, kind: output, shape index: {}]  }
   0x1   :  { %10 = vsyncpa [#allocation5], 0  ;;  %s446_s15 = smov [#allocation4]   ;;  %s447_s17 = smov [#allocation2]  }
   0x2   :  { %s27_s16 = sshll.u32 %s446_s15, 4  ;;  %s17_s18 = sshll.u32 %s447_s17, 4  ;;  %s28_s16 = int_to_ptr.vmem [resolvable:$true] %s27_s16  ;;  %s18_s18 = int_to_ptr.vmem [resolvable:$true] %s17_s18 }
   0x3   :  { %s376_s21 = scalar_lea.hbm %s525_s1, 128 }
   0x4   :  { %p377_p0 = scmp.ne.s32.totalorder %s525_s1, %s376_s21  ;;  %p380_p1 = scmp.lt.u32.totalorder %s376_s21, %s525_s1 }
   0x6   :  { %p382_p2 = pnand %p380_p1, %p377_p0 }
   0x8   :  { %385 = shalt.err (!%p382_p2)
}
   0x9   :  { %s386_s26 = scalar_lea.vmem %s28_s16, 128  ;;  %p391_p4 = scmp.lt.s32.totalorder %s28_s16, %s28_s16 }
   0xa   :  { %p387_p3 = scmp.ne.s32.totalorder %s28_s16, %s386_s26  ;;  %p392_p5 = scmp.lt.s32.totalorder %s386_s26, %s386_s26 }
   0xc   :  { %p393_p6 = por %p392_p5, %p391_p4 }
   0xe   :  { %p394_p7 = pnand %p393_p6, %p387_p3 }
  0x10   :  { %397 = shalt.err (!%p394_p7)
}
  0x11   :  { %30 = dma.hbm_to_vmem [thread:$0]  %s525_s1, 128, %s28_s16, [#allocation5]  }
  0x12   :  { %s398_s5 = scalar_lea.hbm %s524_s0, 128 }
  0x13   :  { %p399_p8 = scmp.ne.s32.totalorder %s524_s0, %s398_s5  ;;  %p402_p9 = scmp.lt.u32.totalorder %s398_s5, %s524_s0 }
  0x15   :  { %p404_p10 = pnand %p402_p9, %p399_p8 }
  0x17   :  { %407 = shalt.err (!%p404_p10)
}
  0x18   :  { %s408_s10 = scalar_lea.vmem %s18_s18, 128  ;;  %p413_p12 = scmp.lt.s32.totalorder %s18_s18, %s18_s18 }
  0x19   :  { %p409_p11 = scmp.ne.s32.totalorder %s18_s18, %s408_s10  ;;  %p414_p13 = scmp.lt.s32.totalorder %s408_s10, %s408_s10 }
  0x1b   :  { %p415_p0 = por %p414_p13, %p413_p12 }
  0x1d   :  { %p416_p1 = pnand %p415_p0, %p409_p11 }
  0x1f   :  { %419 = shalt.err (!%p416_p1)
}
  0x20   :  { %20 = dma.hbm_to_vmem [thread:$0]  %s524_s0, 128, %s18_s18, [#allocation3]  }
  0x21   :  { %s448_s12 = smov [#allocation6]   ;;  %s420_s16 = scalar_lea.hbm %s526_s2, 128 }
  0x22   :  { %s37_s13 = sshll.u32 %s448_s12, 4  ;;  %p421_p2 = scmp.ne.s32.totalorder %s526_s2, %s420_s16  ;;  %s38_s13 = int_to_ptr.vmem [resolvable:$true] %s37_s13 }
  0x23   :  { %p424_p3 = scmp.lt.u32.totalorder %s420_s16, %s526_s2 }
  0x25   :  { %p426_p4 = pnand %p424_p3, %p421_p2 }
  0x27   :  { %429 = shalt.err (!%p426_p4)
}
  0x28   :  { %s430_s22 = scalar_lea.vmem %s38_s13, 128  ;;  %p435_p6 = scmp.lt.s32.totalorder %s38_s13, %s38_s13 }
  0x29   :  { %p431_p5 = scmp.ne.s32.totalorder %s38_s13, %s430_s22  ;;  %p436_p7 = scmp.lt.s32.totalorder %s430_s22, %s430_s22 }
  0x2b   :  { %p437_p8 = por %p436_p7, %p435_p6 }
  0x2d   :  { %p438_p9 = pnand %p437_p8, %p431_p5 }
  0x2f   :  { %441 = shalt.err (!%p438_p9)
}
  0x30   :  { %40 = dma.hbm_to_vmem [thread:$0]  %s526_s2, 128, %s38_s13, [#allocation5]  }
  0x31   :  { %442 = dma.done.wait [#allocation3], 128  }
  0x32   :  { %443 = vsyncadd [#allocation3], 4294967168 }
  0x33   :  { %444 = dma.done.wait [#allocation5], 256  }
  0x34   :  { %445 = vsyncadd [#allocation5], 4294967040  ;;  %v449_v0 = vmov 0.0   ;;  %vm450_vm0 = vmmov 0   ;;  %v451_v1 = vmov 0.0|0.0   ;;  %vm56_vm1 = vcmask 261120  }
  0x35   :  { %335 = vmatprep.subr.mxu0 %v449_v0  ;;  %337 = vmatprep.mubr.msk.f32.mxu0 %vm450_vm0, %v449_v0  ;;  %v452_v2 = vmov 1.0|1.0   ;;  %v54_v3 = vld [vmem:[#allocation6] sm:$0xff]  ;;  %v52_v4 = vld [vmem:[#allocation2] sm:$0xff]  ;;  %v53_v5 = vld [vmem:[#allocation4] sm:$0xff]  ;;  %v453_v7 = vmov 1.0  }
  0x36   :  { %356 = vmatprep.subr.bf16.mxu1 %v451_v1  ;;  %348 = vmatprep.mubr.msk.f32.mxu1 %vm450_vm0, %v449_v0  ;;  %v133_v6 = vmul.f32 %v53_v5, %v52_v4  ;;  %v55_v24 = vld [vmem:[%s527_s3] sm:$0xff]  ;;  %vm239_vm3 = vcmask 64512   ;;  %vm314_vm5 = vcmask 7168  }
  0x37   :  { %357 = vmatpush3.bf16.msra.mxu1 %v452_v2  ;;  %336 = vmatpush3.xpose.msk.msra.mxu0 %vm56_vm1, %v54_v3 }
  0x38   :  { %358 = vmatprep.subr.bf16.mxu1 %v451_v1  ;;  %351 = vmatprep.subr.mxu0 %v449_v0 }
  0x3a   :  { %338 = vmatmul.mubr.msk.f32.vlgmr.msra.gmra.mrb[0].mxu0 %vm56_vm1, %v53_v5 }
  0x3b   :  { %359 = vmatpush3.bf16.msra.mxu1 %v452_v2  ;;  %353 = vmatprep.mubr.msk.f32.mxu0 %vm450_vm0, %v449_v0 }
  0x3c   :  { %352 = vmatpush3.msra.mxu0 %v453_v7 }
  0x3e   :  { %349 = vmatmul.mubr.msk.f32.vlgmr.msra.gmra.mrb[0].mxu1 %vm56_vm1, %v133_v6 }
 0x10d   :  { %v129_v9 = vpop.f32.mrb[0].mxu0 }
 0x10e   :  { %v224_v11 = vand.u32 2147483647, %v129_v9  ;;  %v339_v12 = vpop.f32.mrb[1].mxu0  ;;  %v223_v23 = vmax.f32 %v129_v9, 0.0 }
 0x110   :  { %v225_v13 = vsub.f32 0.0, %v224_v11 }
 0x111   :  { %v203_v8 = vpop.f32.mrb[0].mxu1 }
 0x112   :  { %v350_v10 = vpop.f32.mrb[1].mxu1  ;;  %v226_v14 = vmul.f32 1.442695, %v225_v13  ;;  %v207_v28 = vsub.f32 0.0, %v203_v8 }
 0x114   :  { %368 = vpow2.f32 %v226_v14  ;;  %v209_v29 = vand.u32 2147483647, %v207_v28  ;;  %v208_v40 = vmax.f32 %v207_v28, 0.0 }
 0x116   :  { %v210_v30 = vsub.f32 0.0, %v209_v29 }
 0x118   :  { %v211_v31 = vmul.f32 1.442695, %v210_v30 }
 0x11e   :  { %v369_v15 = vpop.eup %368 }
 0x11f   :  { %v228_v16 = vadd.f32 1.0, %v369_v15  ;;  %v231_v17 = vmul.f32 -0.5, %v369_v15  ;;  %v234_v19 = vand.u32 2147483647, %v369_v15 }
 0x121   :  { %370 = vlog2.f32 %v228_v16  ;;  %v232_v18 = vadd.f32 1.0, %v231_v17  ;;  %vm235_vm2 = vcmp.lt.f32.partialorder %v234_v19, 0.0004427343 }
 0x122   :  { %372 = vpow2.f32 %v211_v31 }
 0x123   :  { %v233_v22 = vmul.f32 %v369_v15, %v232_v18 }
 0x12b   :  { %v371_v20 = vpop.eup %370 }
 0x12c   :  { %v230_v21 = vmul.f32 0.6931472, %v371_v20  ;;  %v373_v32 = vpop.eup %372 }
 0x12d   :  { %v213_v33 = vadd.f32 1.0, %v373_v32  ;;  %v216_v34 = vmul.f32 -0.5, %v373_v32  ;;  %v219_v37 = vand.u32 2147483647, %v373_v32 }
 0x12e   :  { %v236_v25 = vsel %vm235_vm2, %v233_v22, %v230_v21 }
 0x12f   :  { %v237_v26 = vadd.f32 %v236_v25, %v223_v23  ;;  %374 = vlog2.f32 %v213_v33  ;;  %v217_v35 = vadd.f32 1.0, %v216_v34  ;;  %vm220_vm4 = vcmp.lt.f32.partialorder %v219_v37, 0.0004427343 }
 0x131   :  { %v238_v27 = vmul.f32 %v237_v26, %v55_v24  ;;  %v218_v39 = vmul.f32 %v373_v32, %v217_v35 }
 0x133   :  { %354 = vmatmul.mubr.msk.f32.vlgmr.msra.gmra.mrb[2].mxu0 %vm239_vm3, %v238_v27 }
 0x139   :  { %v375_v36 = vpop.eup %374 }
 0x13a   :  { %v215_v38 = vmul.f32 0.6931472, %v375_v36 }
 0x13c   :  { %v221_v41 = vsel %vm220_vm4, %v218_v39, %v215_v38 }
 0x13d   :  { %v222_v42 = vadd.f32 %v221_v41, %v208_v40 }
 0x206   :  { %v309_v43 = vpop.f32.mrb[2].mxu0 }
 0x207   :  { %v313_v44 = vadd.f32 %v309_v43, %v222_v42  ;;  %v355_v45 = vpop.f32.mrb[3].mxu0 }
 0x209   :  { %315 = vst.msk [vmem:[%s528_s4] sm:$0xff] %vm314_vm5, %v313_v44 }
 0x20a   :  { %320 = vsyncpa [#allocation3], 1 }
 0x20b   :  { %321 = vsyncpa [#allocation5], 1 }

</bundles_post_ra>
